<compile_context>
chip_gen: v7x
topology: tpu7x:2x2x1
jax: 0.10.0
libtpu: 0.0.40
codegen_flags: <defaults>
</compile_context>

<pallas_src>
import math

import jax
import jax.numpy as jnp
from jax.experimental import pallas as pl
from jax.experimental.pallas import tpu as pltpu


def _fc3_kernel(x_ref, wt_ref, b_ref, o_ref):
    # x: (TB, 84), wt: (84, 10) pre-transposed in the wrapper, b: (1, 10)
    acc = jnp.dot(x_ref[...], wt_ref[...], preferred_element_type=jnp.float32)
    o_ref[...] = (acc + b_ref[...]).astype(o_ref.dtype)


def _cost_estimate(B, in_f, out_f, x_itemsize, out_itemsize, w_bytes, b_bytes):
    return pl.CostEstimate(
        flops=2 * B * in_f * out_f,
        transcendentals=0,
        bytes_accessed=B * in_f * x_itemsize + B * out_f * out_itemsize
        + w_bytes + b_bytes,
    )


def lenet_out_forward(features, weight, bias, *, block_rows=8192):
    """features: (B, 84); weight: (10, 84) (PyTorch layout); bias: (10,).

    Returns logits of shape (B, 10) with the same dtype as `features`
    (accumulation is always f32 on the MXU).
    """
    B, in_f = features.shape
    out_f = weight.shape[0]
    out_dtype = features.dtype

    # One-time, wrapper-side layout fixups (weight is ~3.4 KB -> free):
    #   * transpose to (84, 10) so the kernel runs a plain (M,K)@(K,N) matmul
    #   * match the activation dtype so bf16 inputs stay on the bf16 MXU path
    w_t = jnp.transpose(weight).astype(features.dtype)
    b2 = bias.reshape(1, out_f).astype(jnp.float32)  # added post-accumulation

    ce = _cost_estimate(
        B, in_f, out_f,
        jnp.dtype(features.dtype).itemsize,
        jnp.dtype(out_dtype).itemsize,
        w_t.size * jnp.dtype(w_t.dtype).itemsize,
        b2.size * 4,
    )

    if B <= block_rows:
        # Single-tile problem: no grid, no pipelining machinery. Everything
        # lives in VMEM for the duration of the (tiny) kernel.
        return pl.pallas_call(
            _fc3_kernel,
            out_shape=jax.ShapeDtypeStruct((B, out_f), out_dtype),
            in_specs=[
                pl.BlockSpec(memory_space=pltpu.MemorySpace.VMEM),  # features
                pl.BlockSpec(memory_space=pltpu.MemorySpace.VMEM),  # weight.T
                pl.BlockSpec(memory_space=pltpu.MemorySpace.VMEM),  # bias
            ],
            out_specs=pl.BlockSpec(memory_space=pltpu.MemorySpace.VMEM),
            cost_estimate=ce,
        )(features, w_t, b2)

    # Large batch: tile the batch axis. Pick an even step count (>=2) so the
    # 'parallel' grid axis load-balances across v7x's two TensorCores, and
    # align the tile to 16 rows (covers f32 and bf16 sublane packing).
    steps = math.ceil(B / block_rows)
    if steps % 2 == 1 and steps > 1:
        steps += 1
    tile = math.ceil(B / steps)
    tile = ((tile + 15) // 16) * 16
    grid = (math.ceil(B / tile),)

    return pl.pallas_call(
        _fc3_kernel,
        out_shape=jax.ShapeDtypeStruct((B, out_f), out_dtype),
        grid_spec=pltpu.PrefetchScalarGridSpec(
            num_scalar_prefetch=0,
            grid=grid,
            in_specs=[
                pl.BlockSpec((tile, in_f), lambda i: (i, 0)),   # activations stream
                pl.BlockSpec((in_f, out_f), lambda i: (0, 0)),  # weight resident
                pl.BlockSpec((1, out_f), lambda i: (0, 0)),     # bias resident
            ],
            out_specs=pl.BlockSpec((tile, out_f), lambda i: (i, 0)),
        ),
        compiler_params=pltpu.CompilerParams(
            # Batch tiles are independent -> shard across TCs on v7x.
            dimension_semantics=("parallel",),
        ),
        cost_estimate=ce,
    )(features, w_t, b2)


# TODO(synk): when used inside the full LeNet head, fuse fc2+ReLU (and ideally
# the downstream softmax/loss) into this same pallas_call so the (B, 84)
# activations and (B, 10) logits never round-trip through HBM — that removes
# ~90% of the bytes this standalone kernel touches. Standalone here per spec.


if __name__ == "__main__":
    key = jax.random.PRNGKey(0)
    k_x, k_w, k_b, k_x2 = jax.random.split(key, 4)

    B, IN_F, OUT_F = 2, 84, 10

    # Deterministic parameter init (mirrors nn.Linear's uniform(-1/sqrt(in), 1/sqrt(in)))
    bound = 1.0 / jnp.sqrt(jnp.float32(IN_F))
    weight = jax.random.uniform(k_w, (OUT_F, IN_F), jnp.float32, -bound, bound)
    bias = jax.random.uniform(k_b, (OUT_F,), jnp.float32, -bound, bound)

    # --- small batch (module-scale): no-grid path ---
    features = jax.random.normal(k_x, (B, IN_F), jnp.float32)
    out = jax.block_until_ready(lenet_out_forward(features, weight, bias))
    ref = features @ weight.T + bias
    assert out.shape == (B, OUT_F)
    assert out.dtype == jnp.float32
    assert jnp.allclose(out, ref, atol=1e-5, rtol=1e-5)

    # --- larger, non-multiple batch: tiled 'parallel' grid path (2 even steps,
    # last tile partially masked) ---
    B2 = 10000
    features2 = jax.random.normal(k_x2, (B2, IN_F), jnp.float32)
    out2 = jax.block_until_ready(
        lenet_out_forward(features2, weight, bias, block_rows=8192))
    ref2 = features2 @ weight.T + bias
    assert out2.shape == (B2, OUT_F)
    assert jnp.allclose(out2, ref2, atol=1e-5, rtol=1e-5)

    print("KERNEL_OK")
</pallas_src>

<mosaic_0001>
module attributes {stable_mosaic.version = 11 : i64} {
  func.func @_fc3_kernel(%arg0: memref<2x84xf32, #tpu.memory_space<vmem>>, %arg1: memref<84x10xf32, #tpu.memory_space<vmem>>, %arg2: memref<1x10xf32, #tpu.memory_space<vmem>>, %arg3: memref<2x10xf32, #tpu.memory_space<vmem>>) attributes {dimension_semantics = [], scalar_prefetch = 0 : i64, scratch_operands = 0 : i64, tpu.core_type = #tpu.core_type<tc>} {
    %c0 = arith.constant 0 : index
    %c0_0 = arith.constant 0 : index
    %0 = vector.load %arg0[%c0, %c0_0] : memref<2x84xf32, #tpu.memory_space<vmem>>, vector<2x84xf32>
    %c0_1 = arith.constant 0 : index
    %c0_2 = arith.constant 0 : index
    %1 = vector.load %arg1[%c0_1, %c0_2] : memref<84x10xf32, #tpu.memory_space<vmem>>, vector<84x10xf32>
    %cst = arith.constant dense<0.000000e+00> : vector<2x10xf32>
    %2 = tpu.matmul %0, %1, %cst {dimension_numbers = #tpu.dot_dimension_numbers<[1], [0], [0], [1], [0, 0, 1, 1], [], []>} : vector<2x84xf32>, vector<84x10xf32>, vector<2x10xf32> -> vector<2x10xf32>
    %c0_3 = arith.constant 0 : index
    %c0_4 = arith.constant 0 : index
    %3 = vector.load %arg2[%c0_3, %c0_4] : memref<1x10xf32, #tpu.memory_space<vmem>>, vector<1x10xf32>
    %4 = vector.broadcast %3 : vector<1x10xf32> to vector<2x10xf32>
    %5 = arith.addf %2, %4 : vector<2x10xf32>
    %c0_5 = arith.constant 0 : index
    %c0_6 = arith.constant 0 : index
    %6 = vector.load %arg3[%c0_5, %c0_6] : memref<2x10xf32, #tpu.memory_space<vmem>>, vector<2x10xf32>
    tpu.vector_store %arg3[%c0_5, %c0_6], %5 {strides = array<i32>} : memref<2x10xf32, #tpu.memory_space<vmem>>, vector<2x10xf32>,
    return
  }
}

</mosaic_0001>

<bundles_post_ra>
// kernel: tpu_custom_call.1
= control target key start
LH: loop header
LB: loop body
LE: loop exit
PB: predicated region body
PF: predicated region fallthrough
CT: control target
= control target key end

     0   :  { %v211_v3 = vmov 0.0|0.0   ;;  %vm212_vm0 = vmmov 0   ;;  %v213_v6 = vmov 0.0   ;;  %s286_s0 = inlined_call_operand.vmem [shape: f32[2,84], index: 0, kind: input, shape index: {}]   ;;  %s287_s1 = inlined_call_operand.vmem [shape: f32[84,10], index: 1, kind: input, shape index: {}]   ;;  %s288_s2 = inlined_call_operand.vmem [shape: f32[1,10], index: 2, kind: input, shape index: {}]   ;;  %s289_s3 = inlined_call_operand.hbm [shape: f32[2,10], index: 3, kind: output, shape index: {}]  }
   0x1   :  { %v16_v0 = vld [vmem:[%s287_s1] sm:$0xff]  ;;  %v17_v1 = vld [vmem:[%s287_s1 + $0x8] sm:$0xff]  ;;  %v18_v2 = vld [vmem:[%s287_s1 + $0x10] sm:$0xff]  ;;  %168 = vmatprep.subr.bf16.mxu0 %v211_v3  ;;  %165 = vmatprep.mubr.msk.f32.mxu0 %vm212_vm0, %v213_v6 }
   0x2   :  { %v169_v4 = vpack.c.bf16 %v17_v1, %v16_v0  ;;  %v19_v5 = vld [vmem:[%s287_s1 + $0x18] sm:$0xff]  ;;  %v20_v8 = vld [vmem:[%s287_s1 + $0x20] sm:$0xff]  ;;  %v21_v9 = vld [vmem:[%s287_s1 + $0x28] sm:$0xff] }
   0x3   :  { %v172_v7 = vpack.c.bf16 %v19_v5, %v18_v2 }
   0x4   :  { %170 = vmatpush3.bf16.msra.mxu0 %v169_v4 }
   0x5   :  { %171 = vmatprep.subr.bf16.mxu0 %v211_v3 }
   0x6   :  { %8 = vsyncpa [#allocation3], 0  ;;  %v175_v10 = vpack.c.bf16 %v21_v9, %v20_v8  ;;  %v22_v11 = vld [vmem:[%s287_s1 + $0x30] sm:$0xff]  ;;  %v23_v12 = vld [vmem:[%s287_s1 + $0x38] sm:$0xff]  ;;  %vm38_vm1 = vcmask 1043456   ;;  %vm34_vm2 = vcmask 687104  }
   0x7   :  { %v178_v13 = vpack.c.bf16 %v23_v12, %v22_v11  ;;  %v24_v14 = vld [vmem:[%s287_s1 + $0x40] sm:$0xff]  ;;  %v25_v15 = vld [vmem:[%s287_s1 + $0x48] sm:$0xff]  ;;  %v26_v17 = vld [vmem:[%s287_s1 + $0x50] sm:$0xf]  ;;  %s214_s11 = smov [#allocation2]   ;;  %vm112_vm3 = vcmask 74752  }
   0x8   :  { %173 = vmatpush3.bf16.msra.mxu0 %v172_v7  ;;  %v181_v16 = vpack.c.bf16 %v25_v15, %v24_v14  ;;  %v15_v18 = vld [vmem:[%s286_s0] sm:$0x3]  ;;  %s120_s12 = sshll.u32 %s214_s11, 4  ;;  %s121_s12 = int_to_ptr.vmem [resolvable:$true] %s120_s12 }
   0x9   :  { %174 = vmatprep.subr.bf16.mxu0 %v211_v3  ;;  %v128_v19 = vld [vmem:[%s288_s2] ss:$0 sm:$0xff]  ;;  %s187_s1 = scalar_lea.vmem %s121_s12, 32  ;;  %p192_p1 = scmp.lt.s32.totalorder %s121_s12, %s121_s12 }
   0xa   :  { %p188_p0 = scmp.ne.s32.totalorder %s121_s12, %s187_s1  ;;  %p193_p2 = scmp.lt.s32.totalorder %s187_s1, %s187_s1 }
   0xc   :  { %176 = vmatpush3.bf16.msra.mxu0 %v175_v10  ;;  %p194_p3 = por %p193_p2, %p192_p1 }
   0xd   :  { %177 = vmatprep.subr.bf16.mxu0 %v211_v3 }
   0xe   :  { %p195_p4 = pnand %p194_p3, %p188_p0 }
  0x10   :  { %179 = vmatpush3.bf16.msra.mxu0 %v178_v13 }
  0x11   :  { %180 = vmatprep.subr.bf16.mxu0 %v211_v3 }
  0x14   :  { %182 = vmatpush3.bf16.msra.mxu0 %v181_v16 }
  0x15   :  { %163 = vmatprep.subr.mxu0 %v213_v6 }
  0x18   :  { %164 = vmatpush3.msk.msra.mxu0 %vm38_vm1, %v26_v17 }
  0x19   :  { %166 = vmatmul.mubr.msk.f32.vlgmr.msra.gmra.mrb[0].mxu0 %vm34_vm2, %v15_v18 }
  0xec   :  { %v108_v20 = vpop.f32.mrb[0].mxu0 }
  0xed   :  { %v109_v21 = vadd.f32 %v128_v19, %v108_v20  ;;  %v167_v22 = vpop.f32.mrb[1].mxu0 }
  0xef   :  { %113 = vst.msk [vmem:[#allocation2] sm:$0x3] %vm112_vm3, %v109_v21 }
  0xf0   :  { %198 = shalt.err (!%p195_p4)
}
  0xf1   :  { %s199_s14 = scalar_lea.hbm %s289_s3, 32 }
  0xf2   :  { %p200_p5 = scmp.ne.s32.totalorder %s289_s3, %s199_s14  ;;  %p203_p6 = scmp.lt.u32.totalorder %s199_s14, %s289_s3 }
  0xf4   :  { %p205_p7 = pnand %p203_p6, %p200_p5 }
  0xf6   :  { %208 = shalt.err (!%p205_p7)
}
  0xf7   :  { %123 = dma.vmem_to_hbm [thread:$0]  %s121_s12, 32, %s289_s3, [#allocation3]  }
  0xf8   :  { %209 = dma.done.wait [#allocation3], 32  }
  0xf9   :  { %210 = vsyncadd [#allocation3], 4294967264 }
  0xfa   :  { %127 = vsyncpa [#allocation3], 1 }

</bundles_post_ra>
